<compile_context>
chip_gen: v7x
topology: tpu7x:2x2x1
jax: 0.10.0
libtpu: 0.0.40
codegen_flags: <defaults>
</compile_context>

<pallas_src>
import functools

import jax
import jax.numpy as jnp
from jax.experimental import pallas as pl
from jax.experimental.pallas import tpu as pltpu

NEG_SLOPE = 0.2                     # LeakyReLU negative slope
BN_EPS = 1e-5                       # BatchNorm1d eps
GIN_EPS = 0.0                       # GINConv default eps
TILE_N = 512                        # node-dimension tile for rows (tm) and contraction (tk)
X_RESIDENT_BUDGET = 8 * 2 ** 20     # keep bf16 x VMEM-resident up to this many bytes


def _leaky_relu(x):
    return jnp.where(x > 0, x, NEG_SLOPE * x)


def _round_up(n, m):
    return ((n + m - 1) // m) * m


def _choose_tiles(n):
    """Returns (n_pad, tm, tk) for the node dimension."""
    if n <= TILE_N:
        n_pad = _round_up(n, 8)
        return n_pad, n_pad, n_pad       # single tile; last dim == full dim is allowed
    n_pad = _round_up(n, TILE_N)
    return n_pad, TILE_N, TILE_N


def _pad2(a, rows, cols):
    r, c = a.shape
    return jnp.pad(a, ((0, rows - r), (0, cols - c)))


def _fold_bn_into_linear(bn_params, w, b):
    """BatchNorm1d(eval) followed by Linear(w, b) -> equivalent Linear(w', b')."""
    gamma, beta, mean, var = bn_params[0], bn_params[1], bn_params[2], bn_params[3]
    scale = gamma * jax.lax.rsqrt(var + BN_EPS)      # [C]
    shift = beta - mean * scale                      # [C]
    return scale[:, None] * w, shift @ w + b


def gin_fused_kernel(a_ref, x_ref, p_ref, w1_ref, b1_ref, w2_ref, b2_ref,
                     wf_ref, out_ref, agg_ref, *, tk, x_resident):
    """Fused GINConv + global_add_pool + (BN-folded) fc partial.

    grid = (Ni, Nk): i tiles the node rows of A' / columns of P ("parallel"),
                     k tiles the contraction (neighbor) dimension ("arbitrary").
    agg_ref [tm, Fp] (f32) accumulates A'[i, :] @ x over k.
    out block (1, Gp, Lp) holds this i-tile's contribution (P[:, i] @ mlp(agg)) @ Wf;
    the fc bias and the sum over i-tiles are added by a tiny XLA epilogue.
    """
    k = pl.program_id(1)
    nk = pl.num_programs(1)

    if x_resident:
        # x is fully VMEM-resident; slice the current contraction chunk in-kernel.
        x_blk = x_ref[pl.ds(pl.multiple_of(k * tk, tk), tk), :]
    else:
        x_blk = x_ref[...]

    # A' already contains the (1+eps)*I self term. bf16 x bf16 -> f32 (native MXU path).
    part = jnp.dot(a_ref[...], x_blk, preferred_element_type=jnp.float32)

    @pl.when(k == 0)
    def _():
        agg_ref[...] = part            # first k-step writes directly (no zero-init + reload)

    @pl.when(k > 0)
    def _():
        agg_ref[...] += part

    @pl.when(k == nk - 1)
    def _():
        # GINConv MLP: Linear -> LeakyReLU -> [BN folded into w2/b2] -> Linear -> LeakyReLU.
        # (These f32 matmuls are tiny relative to A'@x; kept f32 for precision.)
        z = jnp.dot(agg_ref[...], w1_ref[...],
                    preferred_element_type=jnp.float32) + b1_ref[...]
        z = _leaky_relu(z)
        z = jnp.dot(z, w2_ref[...],
                    preferred_element_type=jnp.float32) + b2_ref[...]
        rows = _leaky_relu(z).astype(jnp.bfloat16)                               # [tm, Hp]
        # global_add_pool contribution of this node-row tile (bf16 x bf16 -> f32).
        pooled = jnp.dot(p_ref[...], rows, preferred_element_type=jnp.float32)   # [Gp, Hp]
        # Per-row-tile fc partial (BN folded into Wf); bias added in the wrapper.
        res = jnp.dot(pooled, wf_ref[...], preferred_element_type=jnp.float32)   # [Gp, Lp]
        out_ref[...] = res[None]


def gin_cond_forward(x, edge_index, batch, conv_params, bn_final, fc_w, fc_b, n_graphs):
    """Faithful to the reference forward: every conv is applied to the ORIGINAL x and
    only the last x_after is consumed, so only the last conv's parameters are run."""
    n, f_in = x.shape
    params = conv_params[-1]
    hidden = params["w1"].shape[1]
    latent = fc_w.shape[1]

    # ---- fold BatchNorm(eval) into the following Linear (one-time weight prep) ----
    w2f, b2f = _fold_bn_into_linear(params["bn1"], params["w2"], params["b2"])
    wff, bff = _fold_bn_into_linear(bn_final, fc_w, fc_b)

    # ---- padding / tiling (zero padding is exact) ----
    n_pad, tm, tk = _choose_tiles(n)
    f_pad = _round_up(f_in, 128)
    h_pad = _round_up(hidden, 128)
    l_pad = _round_up(latent, 128)
    g_pad = _round_up(n_graphs, 8)

    # ---- operand construction (bf16 is exact for 0/1/small-int adjacency counts) ----
    src, dst = edge_index[0], edge_index[1]
    n_edges = src.shape[0]
    diag = jnp.arange(n, dtype=src.dtype)
    rows = jnp.concatenate([dst, diag])
    cols = jnp.concatenate([src, diag])
    vals = jnp.concatenate([jnp.ones((n_edges,), jnp.float32),
                            jnp.full((n,), 1.0 + GIN_EPS, jnp.float32)])
    adj = (jnp.zeros((n_pad, n_pad), jnp.float32)        # single scatter: edges + self term
           .at[rows, cols].add(vals)
           .astype(jnp.bfloat16))

    batch_pad = jnp.pad(batch, (0, n_pad - n), constant_values=-1)
    pool = (batch_pad[None, :] ==
            jnp.arange(g_pad, dtype=batch.dtype)[:, None]).astype(jnp.bfloat16)

    x_p = _pad2(x, n_pad, f_pad).astype(jnp.bfloat16)    # bf16 inputs: native MXU, half DMA
    w1_p = _pad2(params["w1"], f_pad, h_pad)
    b1_p = _pad2(params["b1"].reshape(1, -1), 1, h_pad)
    w2_p = _pad2(w2f, h_pad, h_pad)
    b2_p = _pad2(b2f.reshape(1, -1), 1, h_pad)
    wf_p = _pad2(wff, h_pad, l_pad)

    ni, nk = n_pad // tm, n_pad // tk
    x_resident = (n_pad * f_pad * 2) <= X_RESIDENT_BUDGET

    if x_resident:
        x_spec = pl.BlockSpec((n_pad, f_pad), lambda i, k: (0, 0))   # resident, fetched once
        x_vmem = n_pad * f_pad
    else:
        x_spec = pl.BlockSpec((tk, f_pad), lambda i, k: (k, 0))      # streamed per k-tile
        x_vmem = tk * f_pad

    # Explicit VMEM budget (v5e default scoped limit is only 16 MiB); cap under v7x 64 MiB.
    vmem_est = (2 * tm * tk * 2                      # A' tile, bf16, double-buffered
                + 2 * x_vmem * 2                     # x, bf16, double-buffered
                + 2 * g_pad * tm * 2                 # pooling matrix tile, bf16
                + 2 * 4 * (f_pad * h_pad + h_pad + h_pad * h_pad + h_pad + h_pad * l_pad)
                + 2 * 4 * g_pad * l_pad              # output block
                + 4 * tm * f_pad)                    # agg scratch
    vmem_limit = int(min(max(32 * 2 ** 20, vmem_est * 3 // 2), 56 * 2 ** 20))

    partials = pl.pallas_call(
        functools.partial(gin_fused_kernel, tk=tk, x_resident=x_resident),
        out_shape=jax.ShapeDtypeStruct((ni, g_pad, l_pad), jnp.float32),
        grid_spec=pltpu.PrefetchScalarGridSpec(
            num_scalar_prefetch=0,
            grid=(ni, nk),
            in_specs=[
                pl.BlockSpec((tm, tk), lambda i, k: (i, k)),        # A' (bf16)
                x_spec,                                             # x (bf16)
                pl.BlockSpec((g_pad, tm), lambda i, k: (0, i)),     # pooling matrix (bf16)
                pl.BlockSpec((f_pad, h_pad), lambda i, k: (0, 0)),  # w1
                pl.BlockSpec((1, h_pad), lambda i, k: (0, 0)),      # b1
                pl.BlockSpec((h_pad, h_pad), lambda i, k: (0, 0)),  # w2 (BN folded)
                pl.BlockSpec((1, h_pad), lambda i, k: (0, 0)),      # b2 (BN folded)
                pl.BlockSpec((h_pad, l_pad), lambda i, k: (0, 0)),  # fc_w (BN folded)
            ],
            out_specs=pl.BlockSpec((1, g_pad, l_pad), lambda i, k: (i, 0, 0)),
            scratch_shapes=[
                pltpu.VMEM((tm, f_pad), jnp.float32),               # aggregation accumulator
            ],
        ),
        compiler_params=pltpu.CompilerParams(
            # i carries no state across tiles -> parallel (v7x megacore); k is the reduction.
            dimension_semantics=("parallel", "arbitrary"),
            vmem_limit_bytes=vmem_limit,
        ),
    )(adj, x_p, pool, w1_p, b1_p, w2_p, b2_p, wf_p)

    # Tiny XLA epilogue: sum per-row-tile fc partials over i, add fc bias, strip padding.
    return partials.sum(axis=0)[:n_graphs, :latent] + bff


def _make_bn_params(key, channels):
    k1, k2, k3, k4 = jax.random.split(key, 4)
    gamma = 1.0 + 0.1 * jax.random.normal(k1, (channels,), jnp.float32)
    beta = 0.1 * jax.random.normal(k2, (channels,), jnp.float32)
    mean = 0.1 * jax.random.normal(k3, (channels,), jnp.float32)
    var = 1.0 + 0.1 * jax.random.uniform(k4, (channels,), jnp.float32)
    return jnp.stack([gamma, beta, mean, var]).astype(jnp.float32)


if __name__ == "__main__":
    # Small shapes consistent with the module: input_dim hard-coded to 95,
    # hidden=32, latent=16, n_layers=1, two graphs of four nodes each.
    N_NODES = 8
    F_IN = 95
    HIDDEN = 32
    LATENT = 16
    N_GRAPHS = 2
    N_LAYERS = 1

    key = jax.random.PRNGKey(0)
    kx, kw1, kb1, kbn1, kw2, kb2, kbnf, kwf, kbf = jax.random.split(key, 9)

    x = jax.random.normal(kx, (N_NODES, F_IN), jnp.float32)

    # Deterministic graph: two 4-node rings, both directions.
    src = jnp.array([0, 1, 2, 3, 1, 2, 3, 0, 4, 5, 6, 7, 5, 6, 7, 4], jnp.int32)
    dst = jnp.array([1, 2, 3, 0, 0, 1, 2, 3, 5, 6, 7, 4, 4, 5, 6, 7], jnp.int32)
    edge_index = jnp.stack([src, dst])                       # [2, E]
    batch = jnp.array([0, 0, 0, 0, 1, 1, 1, 1], jnp.int32)   # node -> graph id

    conv_params = [{
        "w1": 0.1 * jax.random.normal(kw1, (F_IN, HIDDEN), jnp.float32),
        "b1": 0.1 * jax.random.normal(kb1, (HIDDEN,), jnp.float32),
        "bn1": _make_bn_params(kbn1, HIDDEN),
        "w2": 0.1 * jax.random.normal(kw2, (HIDDEN, HIDDEN), jnp.float32),
        "b2": 0.1 * jax.random.normal(kb2, (HIDDEN,), jnp.float32),
    } for _ in range(N_LAYERS)]

    bn_final = _make_bn_params(kbnf, HIDDEN)
    fc_w = 0.1 * jax.random.normal(kwf, (HIDDEN, LATENT), jnp.float32)
    fc_b = 0.1 * jax.random.normal(kbf, (LATENT,), jnp.float32)

    out = gin_cond_forward(x, edge_index, batch, conv_params,
                           bn_final, fc_w, fc_b, N_GRAPHS)
    out = jax.block_until_ready(out)
    assert out.shape == (N_GRAPHS, LATENT)
    assert bool(jnp.all(jnp.isfinite(out)))

    # Pure-JAX references (eval-mode math, unfused/unfolded).
    def _leaky(z):
        return jnp.where(z > 0, z, NEG_SLOPE * z)

    def _bn(z, p):
        return (z - p[2]) * jax.lax.rsqrt(p[3] + BN_EPS) * p[0] + p[1]

    p = conv_params[-1]

    def reference(x_in, quantize):
        xq = x_in.astype(jnp.bfloat16).astype(jnp.float32) if quantize else x_in
        agg = jnp.zeros_like(xq).at[dst].add(xq[src])
        h = (1.0 + GIN_EPS) * xq + agg
        z = _leaky(h @ p["w1"] + p["b1"])
        z = _bn(z, p["bn1"])
        z = _leaky(z @ p["w2"] + p["b2"])
        if quantize:
            z = z.astype(jnp.bfloat16).astype(jnp.float32)
        pooled = jnp.zeros((N_GRAPHS, HIDDEN), jnp.float32).at[batch].add(z)
        return _bn(pooled, bn_final) @ fc_w + fc_b

    # Tight check vs a reference quantized at exactly the kernel's bf16 MXU input points.
    expected_q = reference(x, quantize=True)
    assert bool(jnp.allclose(out, expected_q, atol=2e-3, rtol=2e-3))

    # Loose check vs the full-f32 (PyTorch-faithful) reference: differences are bounded by
    # standard bf16 matmul-input rounding (f32 accumulation throughout).
    expected_f32 = reference(x, quantize=False)
    assert bool(jnp.allclose(out, expected_f32, atol=3e-2, rtol=3e-2))

    print("KERNEL_OK")
</pallas_src>

<mosaic_0001>
module attributes {stable_mosaic.version = 11 : i64} {
  func.func @gin_fused_kernel(%arg0: i32, %arg1: i32, %arg2: memref<8x8xbf16, #tpu.memory_space<vmem>>, %arg3: memref<8x128xbf16, #tpu.memory_space<vmem>>, %arg4: memref<8x8xbf16, #tpu.memory_space<vmem>>, %arg5: memref<128x128xf32, #tpu.memory_space<vmem>>, %arg6: memref<1x128xf32, #tpu.memory_space<vmem>>, %arg7: memref<128x128xf32, #tpu.memory_space<vmem>>, %arg8: memref<1x128xf32, #tpu.memory_space<vmem>>, %arg9: memref<128x128xf32, #tpu.memory_space<vmem>>, %arg10: memref<1x8x128xf32, #tpu.memory_space<vmem>>, %arg11: memref<8x128xf32, #tpu.memory_space<vmem>>) attributes {dimension_semantics = [#tpu.dimension_semantics<parallel>, #tpu.dimension_semantics<arbitrary>], iteration_bounds = array<i64: 1, 1>, scalar_prefetch = 0 : i64, scratch_operands = 1 : i64, tpu.core_type = #tpu.core_type<tc>, window_params = [{transform_indices = @transform_0, window_bounds = array<i64: 8, 8>}, {pipeline_mode = #tpu.pipeline_mode<synchronous>, transform_indices = @transform_1, window_bounds = array<i64: 8, 128>}, {transform_indices = @transform_2, window_bounds = array<i64: 8, 8>}, {pipeline_mode = #tpu.pipeline_mode<synchronous>, transform_indices = @transform_3, window_bounds = array<i64: 128, 128>}, {pipeline_mode = #tpu.pipeline_mode<synchronous>, transform_indices = @transform_4, window_bounds = array<i64: 1, 128>}, {pipeline_mode = #tpu.pipeline_mode<synchronous>, transform_indices = @transform_5, window_bounds = array<i64: 128, 128>}, {pipeline_mode = #tpu.pipeline_mode<synchronous>, transform_indices = @transform_6, window_bounds = array<i64: 1, 128>}, {pipeline_mode = #tpu.pipeline_mode<synchronous>, transform_indices = @transform_7, window_bounds = array<i64: 128, 128>}, {transform_indices = @transform_8, window_bounds = array<i64: 1, 8, 128>}]} {
    %c8_i32 = arith.constant 8 : i32
    %0 = arith.muli %arg1, %c8_i32 : i32
    %1 = tpu.assume_multiple %0, 8 : i32
    %2 = arith.index_cast %1 : i32 to index
    %c0 = arith.constant 0 : index
    %3 = vector.load %arg3[%2, %c0] : memref<8x128xbf16, #tpu.memory_space<vmem>>, vector<8x128xbf16>
    %c0_0 = arith.constant 0 : index
    %c0_1 = arith.constant 0 : index
    %4 = vector.load %arg2[%c0_0, %c0_1] : memref<8x8xbf16, #tpu.memory_space<vmem>>, vector<8x8xbf16>
    %cst = arith.constant dense<0.000000e+00> : vector<8x128xf32>
    %5 = tpu.matmul %4, %3, %cst {dimension_numbers = #tpu.dot_dimension_numbers<[1], [0], [0], [1], [0, 0, 1, 1], [], []>} : vector<8x8xbf16>, vector<8x128xbf16>, vector<8x128xf32> -> vector<8x128xf32>
    %c0_i32 = arith.constant 0 : i32
    %6 = arith.cmpi eq, %arg1, %c0_i32 : i32
    %7 = arith.extui %6 : i1 to i32
    %c0_i32_2 = arith.constant 0 : i32
    %8 = arith.cmpi ne, %7, %c0_i32_2 : i32
    scf.if %8 {
      %c0_7 = arith.constant 0 : index
      %c0_8 = arith.constant 0 : index
      %15 = vector.load %arg11[%c0_7, %c0_8] : memref<8x128xf32, #tpu.memory_space<vmem>>, vector<8x128xf32>
      tpu.vector_store %arg11[%c0_7, %c0_8], %5 {strides = array<i32>} : memref<8x128xf32, #tpu.memory_space<vmem>>, vector<8x128xf32>,
    } else {
    }
    %c0_i32_3 = arith.constant 0 : i32
    %9 = arith.cmpi sgt, %arg1, %c0_i32_3 : i32
    %10 = arith.extui %9 : i1 to i32
    %c0_i32_4 = arith.constant 0 : i32
    %11 = arith.cmpi ne, %10, %c0_i32_4 : i32
    scf.if %11 {
      %c0_7 = arith.constant 0 : index
      %c0_8 = arith.constant 0 : index
      %15 = vector.load %arg11[%c0_7, %c0_8] : memref<8x128xf32, #tpu.memory_space<vmem>>, vector<8x128xf32>
      %16 = arith.addf %15, %5 : vector<8x128xf32>
      %c0_9 = arith.constant 0 : index
      %c0_10 = arith.constant 0 : index
      %17 = vector.load %arg11[%c0_9, %c0_10] : memref<8x128xf32, #tpu.memory_space<vmem>>, vector<8x128xf32>
      tpu.vector_store %arg11[%c0_9, %c0_10], %16 {strides = array<i32>} : memref<8x128xf32, #tpu.memory_space<vmem>>, vector<8x128xf32>,
    } else {
    }
    %c0_i32_5 = arith.constant 0 : i32
    %12 = arith.cmpi eq, %arg1, %c0_i32_5 : i32
    %13 = arith.extui %12 : i1 to i32
    %c0_i32_6 = arith.constant 0 : i32
    %14 = arith.cmpi ne, %13, %c0_i32_6 : i32
    scf.if %14 {
      %c0_7 = arith.constant 0 : index
      %c0_8 = arith.constant 0 : index
      %15 = vector.load %arg11[%c0_7, %c0_8] : memref<8x128xf32, #tpu.memory_space<vmem>>, vector<8x128xf32>
      %c0_9 = arith.constant 0 : index
      %c0_10 = arith.constant 0 : index
      %16 = vector.load %arg5[%c0_9, %c0_10] : memref<128x128xf32, #tpu.memory_space<vmem>>, vector<128x128xf32>
      %cst_11 = arith.constant dense<0.000000e+00> : vector<8x128xf32>
      %17 = tpu.matmul %15, %16, %cst_11 {dimension_numbers = #tpu.dot_dimension_numbers<[1], [0], [0], [1], [0, 0, 1, 1], [], []>} : vector<8x128xf32>, vector<128x128xf32>, vector<8x128xf32> -> vector<8x128xf32>
      %c0_12 = arith.constant 0 : index
      %c0_13 = arith.constant 0 : index
      %18 = vector.load %arg6[%c0_12, %c0_13] : memref<1x128xf32, #tpu.memory_space<vmem>>, vector<1x128xf32>
      %19 = vector.broadcast %18 : vector<1x128xf32> to vector<8x128xf32>
      %20 = arith.addf %17, %19 : vector<8x128xf32>
      %cst_14 = arith.constant 0.000000e+00 : f32
      %21 = vector.broadcast %cst_14 : f32 to vector<8x128xf32>
      %22 = arith.cmpf ogt, %20, %21 : vector<8x128xf32>
      %cst_15 = arith.constant 2.000000e-01 : f32
      %23 = vector.broadcast %cst_15 : f32 to vector<8x128xf32>
      %24 = arith.mulf %23, %20 : vector<8x128xf32>
      %25 = arith.select %22, %20, %24 : vector<8x128xi1>, vector<8x128xf32>
      %c0_16 = arith.constant 0 : index
      %c0_17 = arith.constant 0 : index
      %26 = vector.load %arg7[%c0_16, %c0_17] : memref<128x128xf32, #tpu.memory_space<vmem>>, vector<128x128xf32>
      %cst_18 = arith.constant dense<0.000000e+00> : vector<8x128xf32>
      %27 = tpu.matmul %25, %26, %cst_18 {dimension_numbers = #tpu.dot_dimension_numbers<[1], [0], [0], [1], [0, 0, 1, 1], [], []>} : vector<8x128xf32>, vector<128x128xf32>, vector<8x128xf32> -> vector<8x128xf32>
      %c0_19 = arith.constant 0 : index
      %c0_20 = arith.constant 0 : index
      %28 = vector.load %arg8[%c0_19, %c0_20] : memref<1x128xf32, #tpu.memory_space<vmem>>, vector<1x128xf32>
      %29 = vector.broadcast %28 : vector<1x128xf32> to vector<8x128xf32>
      %30 = arith.addf %27, %29 : vector<8x128xf32>
      %cst_21 = arith.constant 0.000000e+00 : f32
      %31 = vector.broadcast %cst_21 : f32 to vector<8x128xf32>
      %32 = arith.cmpf ogt, %30, %31 : vector<8x128xf32>
      %cst_22 = arith.constant 2.000000e-01 : f32
      %33 = vector.broadcast %cst_22 : f32 to vector<8x128xf32>
      %34 = arith.mulf %33, %30 : vector<8x128xf32>
      %35 = arith.select %32, %30, %34 : vector<8x128xi1>, vector<8x128xf32>
      %36 = arith.truncf %35 : vector<8x128xf32> to vector<8x128xbf16>
      %c0_23 = arith.constant 0 : index
      %c0_24 = arith.constant 0 : index
      %37 = vector.load %arg4[%c0_23, %c0_24] : memref<8x8xbf16, #tpu.memory_space<vmem>>, vector<8x8xbf16>
      %cst_25 = arith.constant dense<0.000000e+00> : vector<8x128xf32>
      %38 = tpu.matmul %37, %36, %cst_25 {dimension_numbers = #tpu.dot_dimension_numbers<[1], [0], [0], [1], [0, 0, 1, 1], [], []>} : vector<8x8xbf16>, vector<8x128xbf16>, vector<8x128xf32> -> vector<8x128xf32>
      %c0_26 = arith.constant 0 : index
      %c0_27 = arith.constant 0 : index
      %39 = vector.load %arg9[%c0_26, %c0_27] : memref<128x128xf32, #tpu.memory_space<vmem>>, vector<128x128xf32>
      %cst_28 = arith.constant dense<0.000000e+00> : vector<8x128xf32>
      %40 = tpu.matmul %38, %39, %cst_28 {dimension_numbers = #tpu.dot_dimension_numbers<[1], [0], [0], [1], [0, 0, 1, 1], [], []>} : vector<8x128xf32>, vector<128x128xf32>, vector<8x128xf32> -> vector<8x128xf32>
      %41 = vector.shape_cast %40 : vector<8x128xf32> to vector<1x8x128xf32>
      %c0_29 = arith.constant 0 : index
      %c0_30 = arith.constant 0 : index
      %c0_31 = arith.constant 0 : index
      %42 = vector.load %arg10[%c0_29, %c0_30, %c0_31] : memref<1x8x128xf32, #tpu.memory_space<vmem>>, vector<1x8x128xf32>
      tpu.vector_store %arg10[%c0_29, %c0_30, %c0_31], %41 {strides = array<i32>} : memref<1x8x128xf32, #tpu.memory_space<vmem>>, vector<1x8x128xf32>,
    } else {
    }
    return
  }
  func.func @transform_0(%arg0: i32, %arg1: i32) -> (i32, i32) {
    %c0_i32 = arith.constant 0 : i32
    return %arg0, %arg1 : i32, i32
  }
  func.func @transform_1(%arg0: i32, %arg1: i32) -> (i32, i32) {
    %c0_i32 = arith.constant 0 : i32
    %c0_i32_0 = arith.constant 0 : i32
    %c0_i32_1 = arith.constant 0 : i32
    return %c0_i32, %c0_i32_0 : i32, i32
  }
  func.func @transform_2(%arg0: i32, %arg1: i32) -> (i32, i32) {
    %c0_i32 = arith.constant 0 : i32
    %c0_i32_0 = arith.constant 0 : i32
    return %c0_i32, %arg0 : i32, i32
  }
  func.func @transform_3(%arg0: i32, %arg1: i32) -> (i32, i32) {
    %c0_i32 = arith.constant 0 : i32
    %c0_i32_0 = arith.constant 0 : i32
    %c0_i32_1 = arith.constant 0 : i32
    return %c0_i32, %c0_i32_0 : i32, i32
  }
  func.func @transform_4(%arg0: i32, %arg1: i32) -> (i32, i32) {
    %c0_i32 = arith.constant 0 : i32
    %c0_i32_0 = arith.constant 0 : i32
    %c0_i32_1 = arith.constant 0 : i32
    return %c0_i32, %c0_i32_0 : i32, i32
  }
  func.func @transform_5(%arg0: i32, %arg1: i32) -> (i32, i32) {
    %c0_i32 = arith.constant 0 : i32
    %c0_i32_0 = arith.constant 0 : i32
    %c0_i32_1 = arith.constant 0 : i32
    return %c0_i32, %c0_i32_0 : i32, i32
  }
  func.func @transform_6(%arg0: i32, %arg1: i32) -> (i32, i32) {
    %c0_i32 = arith.constant 0 : i32
    %c0_i32_0 = arith.constant 0 : i32
    %c0_i32_1 = arith.constant 0 : i32
    return %c0_i32, %c0_i32_0 : i32, i32
  }
  func.func @transform_7(%arg0: i32, %arg1: i32) -> (i32, i32) {
    %c0_i32 = arith.constant 0 : i32
    %c0_i32_0 = arith.constant 0 : i32
    %c0_i32_1 = arith.constant 0 : i32
    return %c0_i32, %c0_i32_0 : i32, i32
  }
  func.func @transform_8(%arg0: i32, %arg1: i32) -> (i32, i32, i32) {
    %c0_i32 = arith.constant 0 : i32
    %c0_i32_0 = arith.constant 0 : i32
    %c0_i32_1 = arith.constant 0 : i32
    return %arg0, %c0_i32, %c0_i32_0 : i32, i32, i32
  }
}

</mosaic_0001>

<bundles_post_ra>
// kernel: tpu_custom_call.1
= control target key start
LH: loop header
LB: loop body
LE: loop exit
PB: predicated region body
PF: predicated region fallthrough
CT: control target
= control target key end

     0   :  { %13 = vsyncpa [#allocation4], 0  ;;  %s1097_s0 = inlined_call_operand.hbm [shape: bf16[8,8], index: 0, kind: input, shape index: {}]   ;;  %s1098_s1 = inlined_call_operand.hbm [shape: bf16[8,128], index: 1, kind: input, shape index: {}]   ;;  %s1099_s2 = inlined_call_operand.vmem [shape: bf16[8,8], index: 2, kind: input, shape index: {}]   ;;  %s1100_s3 = inlined_call_operand.hbm [shape: f32[128,128], index: 3, kind: input, shape index: {}]   ;;  %s1101_s4 = inlined_call_operand.vmem [shape: f32[1,128], index: 4, kind: input, shape index: {}]   ;;  %s1102_s5 = inlined_call_operand.hbm [shape: f32[128,128], index: 5, kind: input, shape index: {}]   ;;  %s1103_s6 = inlined_call_operand.vmem [shape: f32[1,128], index: 6, kind: input, shape index: {}]   ;;  %s1104_s7 = inlined_call_operand.hbm [shape: f32[128,128], index: 7, kind: input, shape index: {}]   ;;  %s1105_s8 = inlined_call_operand.hbm [shape: f32[1,8,128], index: 8, kind: output, shape index: {}]  }
   0x1   :  { %14 = vsyncpa [#allocation7], 0 }
   0x2   :  { %15 = vsyncpa [#allocation10], 0 }
   0x3   :  { %16 = vsyncpa [#allocation5], 0  ;;  %s911_s27 = smov [#allocation6]   ;;  %s771_s9 = scalar_lea.hbm %s1098_s1, 64 }
   0x4   :  { %s33_s28 = sshll.u32 %s911_s27, 4  ;;  %p772_p0 = scmp.ne.s32.totalorder %s1098_s1, %s771_s9  ;;  %s34_s28 = int_to_ptr.vmem [resolvable:$true] %s33_s28 }
   0x5   :  { %p775_p1 = scmp.lt.u32.totalorder %s771_s9, %s1098_s1 }
   0x7   :  { %p777_p2 = pnand %p775_p1, %p772_p0 }
   0x9   :  { %780 = shalt.err (!%p777_p2)
}
   0xa   :  { %s781_s14 = scalar_lea.vmem %s34_s28, 64  ;;  %p786_p4 = scmp.lt.s32.totalorder %s34_s28, %s34_s28 }
   0xb   :  { %p782_p3 = scmp.ne.s32.totalorder %s34_s28, %s781_s14  ;;  %p787_p5 = scmp.lt.s32.totalorder %s781_s14, %s781_s14 }
   0xd   :  { %p788_p6 = por %p787_p5, %p786_p4 }
   0xf   :  { %p789_p7 = pnand %p788_p6, %p782_p3 }
  0x11   :  { %792 = shalt.err (!%p789_p7)
}
  0x12   :  { %36 = dma.hbm_to_vmem [thread:$0]  %s1098_s1, 64, %s34_s28, [#allocation7]  }
  0x13   :  { %s912_s17 = smov [#allocation9]   ;;  %s913_s19 = smov [#allocation3]  }
  0x14   :  { %s58_s18 = sshll.u32 %s912_s17, 4  ;;  %s23_s20 = sshll.u32 %s913_s19, 4  ;;  %s59_s18 = int_to_ptr.vmem [resolvable:$true] %s58_s18  ;;  %s24_s20 = int_to_ptr.vmem [resolvable:$true] %s23_s20 }
  0x15   :  { %s793_s23 = scalar_lea.hbm %s1102_s5, 2048 }
  0x16   :  { %p794_p8 = scmp.ne.s32.totalorder %s1102_s5, %s793_s23  ;;  %p797_p9 = scmp.lt.u32.totalorder %s793_s23, %s1102_s5 }
  0x18   :  { %p799_p10 = pnand %p797_p9, %p794_p8 }
  0x1a   :  { %802 = shalt.err (!%p799_p10)
}
  0x1b   :  { %s803_s1 = scalar_lea.vmem %s59_s18, 2048  ;;  %p808_p12 = scmp.lt.s32.totalorder %s59_s18, %s59_s18 }
  0x1c   :  { %p804_p11 = scmp.ne.s32.totalorder %s59_s18, %s803_s1  ;;  %p809_p13 = scmp.lt.s32.totalorder %s803_s1, %s803_s1 }
  0x1e   :  { %p810_p0 = por %p809_p13, %p808_p12 }
  0x20   :  { %p811_p1 = pnand %p810_p0, %p804_p11 }
  0x22   :  { %814 = shalt.err (!%p811_p1)
}
  0x23   :  { %s914_s28 = smov 128   ;;  %s915_s29 = smov 8  }
  0x24   :  { %64 = dma.hbm_to_vmem [thread:$0]  %s1102_s5, 2048, %s59_s18, [#allocation10], %s914_s28, %s914_s28, %s915_s29  }
  0x25   :  { %s815_s12 = scalar_lea.hbm %s1097_s0, 64 }
  0x26   :  { %p816_p2 = scmp.ne.s32.totalorder %s1097_s0, %s815_s12  ;;  %p819_p3 = scmp.lt.u32.totalorder %s815_s12, %s1097_s0 }
  0x28   :  { %p821_p4 = pnand %p819_p3, %p816_p2 }
  0x2a   :  { %824 = shalt.err (!%p821_p4)
}
  0x2b   :  { %s825_s17 = scalar_lea.vmem %s24_s20, 64  ;;  %p830_p6 = scmp.lt.s32.totalorder %s24_s20, %s24_s20 }
  0x2c   :  { %p826_p5 = scmp.ne.s32.totalorder %s24_s20, %s825_s17  ;;  %p831_p7 = scmp.lt.s32.totalorder %s825_s17, %s825_s17 }
  0x2e   :  { %p832_p8 = por %p831_p7, %p830_p6 }
  0x30   :  { %p833_p9 = pnand %p832_p8, %p826_p5 }
  0x32   :  { %836 = shalt.err (!%p833_p9)
}
  0x33   :  { %26 = dma.hbm_to_vmem [thread:$0]  %s1097_s0, 64, %s24_s20, [#allocation4]  }
  0x34   :  { %s916_s19 = smov [#allocation8]   ;;  %s917_s22 = smov [#allocation11]  }
  0x35   :  { %s44_s21 = sshll.u32 %s916_s19, 4  ;;  %s72_s23 = sshll.u32 %s917_s22, 4  ;;  %s45_s21 = int_to_ptr.vmem [resolvable:$true] %s44_s21  ;;  %s73_s23 = int_to_ptr.vmem [resolvable:$true] %s72_s23 }
  0x36   :  { %s837_s26 = scalar_lea.hbm %s1100_s3, 2048 }
  0x37   :  { %p838_p10 = scmp.ne.s32.totalorder %s1100_s3, %s837_s26  ;;  %p841_p11 = scmp.lt.u32.totalorder %s837_s26, %s1100_s3 }
  0x39   :  { %p843_p12 = pnand %p841_p11, %p838_p10 }
  0x3b   :  { %846 = shalt.err (!%p843_p12)
}
  0x3c   :  { %s847_s0 = scalar_lea.vmem %s45_s21, 2048  ;;  %p852_p0 = scmp.lt.s32.totalorder %s45_s21, %s45_s21 }
  0x3d   :  { %p848_p13 = scmp.ne.s32.totalorder %s45_s21, %s847_s0  ;;  %p853_p1 = scmp.lt.s32.totalorder %s847_s0, %s847_s0 }
  0x3f   :  { %p854_p2 = por %p853_p1, %p852_p0 }
  0x41   :  { %p855_p3 = pnand %p854_p2, %p848_p13 }
  0x43   :  { %858 = shalt.err (!%p855_p3)
}
  0x44   :  { %50 = dma.hbm_to_vmem [thread:$0]  %s1100_s3, 2048, %s45_s21, [#allocation7], %s914_s28, %s914_s28, %s915_s29  }
  0x45   :  { %s859_s13 = scalar_lea.hbm %s1104_s7, 2048 }
  0x46   :  { %p860_p4 = scmp.ne.s32.totalorder %s1104_s7, %s859_s13  ;;  %p863_p5 = scmp.lt.u32.totalorder %s859_s13, %s1104_s7 }
  0x48   :  { %p865_p6 = pnand %p863_p5, %p860_p4 }
  0x4a   :  { %868 = shalt.err (!%p865_p6)
}
  0x4b   :  { %s869_s5 = scalar_lea.vmem %s73_s23, 2048  ;;  %p874_p8 = scmp.lt.s32.totalorder %s73_s23, %s73_s23 }
  0x4c   :  { %p870_p7 = scmp.ne.s32.totalorder %s73_s23, %s869_s5  ;;  %p875_p9 = scmp.lt.s32.totalorder %s869_s5, %s869_s5 }
  0x4e   :  { %p876_p10 = por %p875_p9, %p874_p8 }
  0x50   :  { %p877_p11 = pnand %p876_p10, %p870_p7 }
  0x52   :  { %880 = shalt.err (!%p877_p11)
}
  0x53   :  { %78 = dma.hbm_to_vmem [thread:$0]  %s1104_s7, 2048, %s73_s23, [#allocation10], %s914_s28, %s914_s28, %s915_s29  }
  0x54   :  { %903 = dma.done.wait [#allocation4], 64  }
  0x55   :  { %904 = vsyncadd [#allocation4], 4294967232 }
  0x56   :  { %905 = dma.done.wait [#allocation7], 2112  }
  0x57   :  { %906 = vsyncadd [#allocation7], 4294965184 }
  0x58   :  { %907 = dma.done.wait [#allocation10], 4096  }
  0x59   :  { %908 = vsyncadd [#allocation10], 4294963200  ;;  %v918_v0 = vmov 0.0   ;;  %vm919_vm0 = vmmov 0   ;;  %v920_v1 = vmov 0.0|0.0   ;;  %vm106_vm1 = vcmask 1043456  }
  0x5a   :  { %571 = vmatprep.subr.bf16.mxu1 %v918_v0  ;;  %573 = vmatprep.mubr.msk.bf16.mxu1 %vm919_vm0, %v918_v0  ;;  %v100_v2 = vld [vmem:[#allocation6] sm:$0xf]  ;;  %v166_v3 = vld [vmem:[#allocation8] sm:$0xff]  ;;  %v167_v5 = vld [vmem:[#allocation8 + $0x8] sm:$0xff]  ;;  %vm102_vm2 = vcmask 64512  }
  0x5b   :  { %712 = vmatprep.subr.bf16.mxu0 %v920_v1  ;;  %644 = vmatprep.mubr.msk.f32.mxu0 %vm919_vm0, %v918_v0  ;;  %v108_v4 = vsel %vm106_vm1, %v100_v2, 0  ;;  %v101_v6 = vld [vmem:[#allocation3] sm:$0xf]  ;;  %v689_v7 = vpack.c.bf16 %v167_v5, %v166_v3  ;;  %v168_v8 = vld [vmem:[#allocation8 + $0x10] sm:$0xff]  ;;  %v170_v11 = vld [vmem:[#allocation8 + $0x20] sm:$0xff] }
  0x5c   :  { %572 = vmatpush3.bf16.msra.mxu1 %v108_v4  ;;  %v169_v9 = vld [vmem:[#allocation8 + $0x18] sm:$0xff]  ;;  %v171_v12 = vld [vmem:[#allocation8 + $0x28] sm:$0xff]  ;;  %v172_v14 = vld [vmem:[#allocation8 + $0x30] sm:$0xff] }
  0x5d   :  { %688 = vmatprep.subr.bf16.mxu1 %v920_v1  ;;  %v692_v10 = vpack.c.bf16 %v169_v9, %v168_v8  ;;  %v695_v13 = vpack.c.bf16 %v171_v12, %v170_v11  ;;  %v173_v15 = vld [vmem:[#allocation8 + $0x38] sm:$0xff]  ;;  %v174_v17 = vld [vmem:[#allocation8 + $0x40] sm:$0xff]  ;;  %v175_v18 = vld [vmem:[#allocation8 + $0x48] sm:$0xff] }
  0x5e   :  { %v698_v16 = vpack.c.bf16 %v173_v15, %v172_v14  ;;  %v701_v19 = vpack.c.bf16 %v175_v18, %v174_v17  ;;  %v176_v20 = vld [vmem:[#allocation8 + $0x50] sm:$0xff]  ;;  %v177_v21 = vld [vmem:[#allocation8 + $0x58] sm:$0xff]  ;;  %v178_v23 = vld [vmem:[#allocation8 + $0x60] sm:$0xff] }
  0x5f   :  { %574 = vmatmul.mubr.msk.bf16.vlgmr.msra.gmra.mrb[0].mxu1 %vm102_vm2, %v101_v6  ;;  %v704_v22 = vpack.c.bf16 %v177_v21, %v176_v20  ;;  %v179_v24 = vld [vmem:[#allocation8 + $0x68] sm:$0xff]  ;;  %v180_v26 = vld [vmem:[#allocation8 + $0x70] sm:$0xff]  ;;  %v181_v27 = vld [vmem:[#allocation8 + $0x78] sm:$0xff] }
  0x60   :  { %690 = vmatpush3.bf16.msra.mxu1 %v689_v7  ;;  %609 = vmatprep.mubr.msk.f32.mxu1 %vm919_vm0, %v918_v0  ;;  %v707_v25 = vpack.c.bf16 %v179_v24, %v178_v23  ;;  %v710_v28 = vpack.c.bf16 %v181_v27, %v180_v26  ;;  %v262_v29 = vld [vmem:[#allocation9] sm:$0xff]  ;;  %v263_v30 = vld [vmem:[#allocation9 + $0x8] sm:$0xff]  ;;  %v264_v31 = vld [vmem:[#allocation9 + $0x10] sm:$0xff] }
  0x61   :  { %691 = vmatprep.subr.bf16.mxu1 %v920_v1  ;;  %v713_v32 = vpack.c.bf16 %v263_v30, %v262_v29  ;;  %v265_v33 = vld [vmem:[#allocation9 + $0x18] sm:$0xff]  ;;  %v266_v35 = vld [vmem:[#allocation9 + $0x20] sm:$0xff]  ;;  %v267_v36 = vld [vmem:[#allocation9 + $0x28] sm:$0xff] }
  0x62   :  { %v716_v34 = vpack.c.bf16 %v265_v33, %v264_v31  ;;  %v719_v37 = vpack.c.bf16 %v267_v36, %v266_v35  ;;  %v268_v38 = vld [vmem:[#allocation9 + $0x30] sm:$0xff]  ;;  %v269_v39 = vld [vmem:[#allocation9 + $0x38] sm:$0xff]  ;;  %v270_v41 = vld [vmem:[#allocation9 + $0x40] sm:$0xff] }
  0x63   :  { %714 = vmatpush3.bf16.msra.mxu0 %v713_v32  ;;  %v722_v40 = vpack.c.bf16 %v269_v39, %v268_v38  ;;  %v271_v42 = vld [vmem:[#allocation9 + $0x48] sm:$0xff]  ;;  %v272_v44 = vld [vmem:[#allocation9 + $0x50] sm:$0xff]  ;;  %v273_v45 = vld [vmem:[#allocation9 + $0x58] sm:$0xff] }
  0x64   :  { %693 = vmatpush3.bf16.msra.mxu1 %v692_v10  ;;  %715 = vmatprep.subr.bf16.mxu0 %v920_v1  ;;  %v725_v43 = vpack.c.bf16 %v271_v42, %v270_v41  ;;  %v728_v46 = vpack.c.bf16 %v273_v45, %v272_v44  ;;  %v274_v47 = vld [vmem:[#allocation9 + $0x60] sm:$0xff]  ;;  %v275_v48 = vld [vmem:[#allocation9 + $0x68] sm:$0xff]  ;;  %v276_v54 = vld [vmem:[#allocation9 + $0x70] sm:$0xff] }
  0x65   :  { %694 = vmatprep.subr.bf16.mxu1 %v920_v1  ;;  %v731_v49 = vpack.c.bf16 %v275_v48, %v274_v47  ;;  %v277_v55 = vld [vmem:[#allocation9 + $0x78] sm:$0xff]  ;;  %v406_v63 = vld [vmem:[#allocation11] sm:$0xff]  ;;  %v407_v2 = vld [vmem:[#allocation11 + $0x8] sm:$0xff] }
  0x66   :  { %v734_v56 = vpack.c.bf16 %v277_v55, %v276_v54  ;;  %v513_v57 = vld [vmem:[%s1101_s4] ss:$0 sm:$0xff]  ;;  %v408_v3 = vld [vmem:[#allocation11 + $0x10] sm:$0xff]  ;;  %v737_v4 = vpack.c.bf16 %v407_v2, %v406_v63  ;;  %v410_v7 = vld [vmem:[#allocation11 + $0x20] sm:$0xff] }
  0x67   :  { %717 = vmatpush3.bf16.msra.mxu0 %v716_v34  ;;  %v409_v5 = vld [vmem:[#allocation11 + $0x18] sm:$0xff]  ;;  %v411_v8 = vld [vmem:[#allocation11 + $0x28] sm:$0xff]  ;;  %v412_v10 = vld [vmem:[#allocation11 + $0x30] sm:$0xff] }
  0x68   :  { %696 = vmatpush3.bf16.msra.mxu1 %v695_v13  ;;  %718 = vmatprep.subr.bf16.mxu0 %v920_v1  ;;  %v740_v6 = vpack.c.bf16 %v409_v5, %v408_v3  ;;  %v743_v9 = vpack.c.bf16 %v411_v8, %v410_v7  ;;  %v413_v11 = vld [vmem:[#allocation11 + $0x38] sm:$0xff]  ;;  %v415_v13 = vld [vmem:[#allocation11 + $0x48] sm:$0xff]  ;;  %v416_v15 = vld [vmem:[#allocation11 + $0x50] sm:$0xff] }
  0x69   :  { %697 = vmatprep.subr.bf16.mxu1 %v920_v1  ;;  %v746_v12 = vpack.c.bf16 %v413_v11, %v412_v10  ;;  %v418_v18 = vld [vmem:[#allocation11 + $0x60] sm:$0xff]  ;;  %v420_v21 = vld [vmem:[#allocation11 + $0x70] sm:$0xff]  ;;  %v514_v24 = vld [vmem:[%s1103_s6] ss:$0 sm:$0xff]  ;;  %s921_s6 = smov [#allocation12]  }
  0x6a   :  { %v359_v32 = vld [vmem:[%s1099_s2] sm:$0xf]  ;;  %s499_s22 = sshll.u32 %s921_s6, 4  ;;  %s500_s22 = int_to_ptr.vmem [resolvable:$true] %s499_s22 }
  0x6b   :  { %720 = vmatpush3.bf16.msra.mxu0 %v719_v37  ;;  %s881_s23 = scalar_lea.vmem %s500_s22, 128  ;;  %p886_p13 = scmp.lt.s32.totalorder %s500_s22, %s500_s22 }
  0x6c   :  { %699 = vmatpush3.bf16.msra.mxu1 %v698_v16  ;;  %721 = vmatprep.subr.bf16.mxu0 %v920_v1  ;;  %v417_v16 = vld [vmem:[#allocation11 + $0x58] sm:$0xff]  ;;  %p882_p12 = scmp.ne.s32.totalorder %s500_s22, %s881_s23  ;;  %p887_p0 = scmp.lt.s32.totalorder %s881_s23, %s881_s23 }
  0x6d   :  { %700 = vmatprep.subr.bf16.mxu1 %v920_v1  ;;  %v752_v17 = vpack.c.bf16 %v417_v16, %v416_v15 }
  0x6e   :  { %p888_p1 = por %p887_p0, %p886_p13 }
  0x6f   :  { %723 = vmatpush3.bf16.msra.mxu0 %v722_v40 }
  0x70   :  { %702 = vmatpush3.bf16.msra.mxu1 %v701_v19  ;;  %724 = vmatprep.subr.bf16.mxu0 %v920_v1  ;;  %v419_v19 = vld [vmem:[#allocation11 + $0x68] sm:$0xff]  ;;  %p889_p2 = pnand %p888_p1, %p882_p12 }
  0x71   :  { %703 = vmatprep.subr.bf16.mxu1 %v920_v1  ;;  %v755_v20 = vpack.c.bf16 %v419_v19, %v418_v18 }
  0x73   :  { %726 = vmatpush3.bf16.msra.mxu0 %v725_v43 }
  0x74   :  { %705 = vmatpush3.bf16.msra.mxu1 %v704_v22  ;;  %727 = vmatprep.subr.bf16.mxu0 %v920_v1  ;;  %v421_v22 = vld [vmem:[#allocation11 + $0x78] sm:$0xff] }
  0x75   :  { %706 = vmatprep.subr.bf16.mxu1 %v920_v1  ;;  %v758_v23 = vpack.c.bf16 %v421_v22, %v420_v21 }
  0x77   :  { %729 = vmatpush3.bf16.msra.mxu0 %v728_v46 }
  0x78   :  { %708 = vmatpush3.bf16.msra.mxu1 %v707_v25  ;;  %730 = vmatprep.subr.bf16.mxu0 %v920_v1 }
  0x79   :  { %709 = vmatprep.subr.bf16.mxu1 %v920_v1 }
  0x7b   :  { %732 = vmatpush3.bf16.msra.mxu0 %v731_v49 }
  0x7c   :  { %711 = vmatpush3.bf16.msra.mxu1 %v710_v28  ;;  %733 = vmatprep.subr.bf16.mxu0 %v920_v1 }
  0x7d   :  { %647 = vmatprep.subr.bf16.mxu1 %v918_v0 }
  0x7f   :  { %735 = vmatpush3.bf16.msra.mxu0 %v734_v56 }
  0x80   :  { %736 = vmatprep.subr.bf16.mxu0 %v920_v1 }
 0x132   :  { %v144_v50 = vpop.f32.mrb[0].mxu1 }
 0x133   :  { %v575_v51 = vpop.f32.mrb[1].mxu1  ;;  %610 = vmatmul.mubr.f32.vlgmr.msra.gmra.mrb[4].mxu1 %v144_v50 }
 0x134   :  { %v147_v52 = vpop.f32.mrb[2].mxu1  ;;  %649 = vmatprep.mubr.msk.bf16.mxu1 %vm919_vm0, %v918_v0 }
 0x135   :  { %v576_v53 = vpop.f32.mrb[3].mxu1 }
 0x206   :  { %v255_v58 = vpop.f32.mrb[4].mxu1 }
 0x207   :  { %v256_v59 = vadd.f32 %v513_v57, %v255_v58  ;;  %v611_v60 = vpop.f32.mrb[5].mxu1 }
 0x209   :  { %v260_v61 = vmul.f32 0.2, %v256_v59  ;;  %vm259_vm3 = vcmp.gt.f32.partialorder %v256_v59, 0.0 }
 0x20b   :  { %v261_v62 = vsel %vm259_vm3, %v256_v59, %v260_v61 }
 0x20c   :  { %645 = vmatmul.mubr.f32.vlgmr.msra.gmra.mrb[0].mxu0 %v261_v62 }
 0x20d   :  { %685 = vmatprep.mubr.msk.f32.mxu0 %vm919_vm0, %v918_v0  ;;  %738 = vmatpush3.bf16.msra.mxu0 %v737_v4  ;;  %v414_v0 = vld [vmem:[#allocation11 + $0x40] sm:$0xff] }
 0x20e   :  { %739 = vmatprep.subr.bf16.mxu0 %v920_v1  ;;  %v749_v14 = vpack.c.bf16 %v415_v13, %v414_v0 }
 0x211   :  { %741 = vmatpush3.bf16.msra.mxu0 %v740_v6 }
 0x212   :  { %742 = vmatprep.subr.bf16.mxu0 %v920_v1 }
 0x215   :  { %744 = vmatpush3.bf16.msra.mxu0 %v743_v9 }
 0x216   :  { %745 = vmatprep.subr.bf16.mxu0 %v920_v1 }
 0x219   :  { %747 = vmatpush3.bf16.msra.mxu0 %v746_v12 }
 0x21a   :  { %748 = vmatprep.subr.bf16.mxu0 %v920_v1 }
 0x21d   :  { %750 = vmatpush3.bf16.msra.mxu0 %v749_v14 }
 0x21e   :  { %751 = vmatprep.subr.bf16.mxu0 %v920_v1 }
 0x221   :  { %753 = vmatpush3.bf16.msra.mxu0 %v752_v17 }
 0x222   :  { %754 = vmatprep.subr.bf16.mxu0 %v920_v1 }
 0x225   :  { %756 = vmatpush3.bf16.msra.mxu0 %v755_v20 }
 0x226   :  { %757 = vmatprep.subr.bf16.mxu0 %v920_v1 }
 0x229   :  { %759 = vmatpush3.bf16.msra.mxu0 %v758_v23 }
 0x2df   :  { %v351_v25 = vpop.f32.mrb[0].mxu0 }
 0x2e0   :  { %v352_v26 = vadd.f32 %v514_v24, %v351_v25  ;;  %v646_v27 = vpop.f32.mrb[1].mxu0 }
 0x2e2   :  { %vm355_vm4 = vcmp.gt.f32.partialorder %v352_v26, 0.0  ;;  %v356_v28 = vmul.f32 0.2, %v352_v26 }
 0x2e4   :  { %v357_v29 = vsel %vm355_vm4, %v352_v26, %v356_v28 }
 0x2e5   :  { %v358_v30 = vpack.c.bf16 %v357_v29, %v357_v29 }
 0x2e7   :  { %v364_v31 = vsel %vm106_vm1, %v358_v30, 0 }
 0x2e8   :  { %648 = vmatpush3.bf16.msra.mxu1 %v364_v31 }
 0x2eb   :  { %650 = vmatmul.mubr.msk.bf16.vlgmr.msra.gmra.mrb[8].mxu1 %vm102_vm2, %v359_v32 }
 0x3be   :  { %v400_v1 = vpop.f32.mrb[8].mxu1 }
 0x3bf   :  { %v651_v33 = vpop.f32.mrb[9].mxu1  ;;  %686 = vmatmul.mubr.f32.vlgmr.msra.gmra.mrb[2].mxu0 %v400_v1 }
 0x3c0   :  { %v403_v34 = vpop.f32.mrb[10].mxu1 }
 0x3c1   :  { %v652_v35 = vpop.f32.mrb[11].mxu1 }
 0x492   :  { %v488_v36 = vpop.f32.mrb[2].mxu0 }
 0x493   :  { %492 = vst [vmem:[#allocation12] sm:$0xff] %v488_v36  ;;  %v687_v37 = vpop.f32.mrb[3].mxu0 }
 0x494   :  { %892 = shalt.err (!%p889_p2)
}
 0x495   :  { %s893_s25 = scalar_lea.hbm %s1105_s8, 128 }
 0x496   :  { %p894_p3 = scmp.ne.s32.totalorder %s1105_s8, %s893_s25  ;;  %p897_p4 = scmp.lt.u32.totalorder %s893_s25, %s1105_s8 }
 0x498   :  { %p899_p5 = pnand %p897_p4, %p894_p3 }
 0x49a   :  { %902 = shalt.err (!%p899_p5)
}
 0x49b   :  { %502 = dma.vmem_to_hbm [thread:$0]  %s500_s22, 128, %s1105_s8, [#allocation5]  }
 0x49c   :  { %909 = dma.done.wait [#allocation5], 128  }
 0x49d   :  { %910 = vsyncadd [#allocation5], 4294967168 }
 0x49e   :  { %506 = vsyncpa [#allocation4], 1 }
 0x49f   :  { %507 = vsyncpa [#allocation7], 1 }
 0x4a0   :  { %508 = vsyncpa [#allocation10], 1 }
 0x4a1   :  { %509 = vsyncpa [#allocation5], 1 }

</bundles_post_ra>
